<compile_context>
chip_gen: v5e
topology: v5e:2x2
jax: 0.10.0
libtpu: 0.0.40
codegen_flags: <defaults>
</compile_context>

<pallas_src>
import jax
import jax.numpy as jnp
from jax.experimental import pallas as pl
from jax.experimental.pallas import tpu as pltpu


def get_env_factorization(domain, skill_dim, skill_channel):
    # Synthetic, deterministic factorization standing in for the env-specific one.
    obs_partition = [3, 5, 6]
    skill_partition = [skill_dim] * skill_channel
    action_partition = [2]
    return obs_partition, skill_partition, action_partition


def _round_up(x, m):
    return ((x + m - 1) // m) * m


# ---------------------------------------------------------------------------
# Init-time parameter re-packing: per-token (max_dim, E) weights -> one
# block-diagonal (sum k_i, T*E_pad) weight.  Rows >= k_i of token i are
# dropped (in PyTorch they only ever multiplied zero padding); the trailing
# axis is zero-padded up to a multiple of 128 so kernel stores are lane-dense.
# ---------------------------------------------------------------------------
def build_block_diagonal_params(weights, biases, token_dims, lane_multiple=128):
    T, _, E = weights.shape
    K = int(sum(token_dims))
    TE = T * E
    TE_pad = _round_up(TE, lane_multiple)
    w_bd = jnp.zeros((K, TE_pad), dtype=weights.dtype)
    off = 0
    for i, k in enumerate(token_dims):
        w_bd = w_bd.at[off:off + k, i * E:(i + 1) * E].set(weights[i, :k, :])
        off += k
    b_flat = jnp.zeros((1, TE_pad), dtype=biases.dtype)
    b_flat = b_flat.at[0, :TE].set(biases.reshape(TE))
    return w_bd, b_flat


# ---------------------------------------------------------------------------
# Kernel: one MXU matmul + bias add, lane-dense (block_b, TE_pad) output.
# ---------------------------------------------------------------------------
def _block_diag_linear_kernel(x_ref, w_ref, b_ref, o_ref):
    # x_ref: (bb, K)  w_ref: (K, TE_pad)  b_ref: (1, TE_pad)  o_ref: (bb, TE_pad)
    y = jnp.dot(x_ref[...], w_ref[...], preferred_element_type=jnp.float32)
    o_ref[...] = (y + b_ref[...]).astype(o_ref.dtype)


def feature_extractor_forward(obs_list, w_bd, b_flat, num_tokens, embed_size,
                              block_b=256, compute_dtype=None):
    """obs_list: list of (B, k_i) arrays (skill + obs + action order).
    w_bd: (sum k_i, TE_pad) block-diagonal weight; b_flat: (1, TE_pad).
    Returns (B, num_tokens, embed_size) in float32.

    compute_dtype: optionally jnp.bfloat16 to feed the MXU in bf16 (f32
    accumulate) for large batches on v6e/v7x; default None keeps exact f32."""
    B = obs_list[0].shape[0]
    K, TE_pad = w_bd.shape
    TE = num_tokens * embed_size

    # Single concat instead of T pads + a (T, B, max_dim) stacked tensor.
    x = jnp.concatenate(obs_list, axis=-1)                     # (B, K)

    if compute_dtype is not None:
        x = x.astype(compute_dtype)
        w_bd = w_bd.astype(compute_dtype)

    # Sublane-aligned batch tile; weights/bias stay fully resident in VMEM.
    # For tiny B this collapses to a single grid step; for large B the batch
    # axis is tiled (multiple of 8 rows) and the grid axis is "parallel".
    bb = min(block_b, _round_up(B, 8))
    b_pad = _round_up(B, bb)
    if b_pad != B:
        x = jnp.pad(x, ((0, b_pad - B), (0, 0)))

    out = pl.pallas_call(
        _block_diag_linear_kernel,
        out_shape=jax.ShapeDtypeStruct((b_pad, TE_pad), jnp.float32),
        grid_spec=pl.GridSpec(
            grid=(pl.cdiv(b_pad, bb),),
            in_specs=[
                pl.BlockSpec((bb, K), lambda i: (i, 0)),
                pl.BlockSpec((K, TE_pad), lambda i: (0, 0)),
                pl.BlockSpec((1, TE_pad), lambda i: (0, 0)),
            ],
            out_specs=pl.BlockSpec((bb, TE_pad), lambda i: (i, 0)),
        ),
        compiler_params=pltpu.CompilerParams(
            dimension_semantics=("parallel",)),
    )(x, w_bd, b_flat)

    # Drop batch / lane padding (view-level slices in XLA) and expose the
    # (B, num_tokens, embed_size) token layout.
    return out[:B, :TE].reshape(B, num_tokens, embed_size)


if __name__ == "__main__":
    # Small, forward-consistent shapes.
    skill_dim, skill_channel, embed_size = 4, 2, 32
    domain = "synthetic"
    B = 2

    obs_p, skill_p, act_p = get_env_factorization(domain, skill_dim, skill_channel)
    all_tokens = skill_p + obs_p + act_p                # order used by the ensemble
    T = len(all_tokens)
    max_dim = max(all_tokens)

    # Deterministic parameter init (PyTorch Linear-style uniform bound),
    # stored per-token in the ensemble layout (T, max_dim, E).
    key = jax.random.PRNGKey(0)
    kw, kb, *kxs = jax.random.split(key, 2 + T)
    bound = 1.0 / (max_dim ** 0.5)
    weights = jax.random.uniform(kw, (T, max_dim, embed_size),
                                 minval=-bound, maxval=bound, dtype=jnp.float32)
    biases = jax.random.uniform(kb, (T, embed_size),
                                minval=-bound, maxval=bound, dtype=jnp.float32)

    # Deterministic example inputs: one (B, k_i) tensor per token.
    obs_list = [jax.random.normal(k, (B, d), dtype=jnp.float32)
                for k, d in zip(kxs, all_tokens)]

    # One-time (init) re-packing into the lane-padded block-diagonal form.
    w_bd, b_flat = build_block_diagonal_params(weights, biases, all_tokens)

    out = feature_extractor_forward(obs_list, w_bd, b_flat, T, embed_size)
    out = jax.block_until_ready(out)
    assert out.shape == (B, T, embed_size), out.shape

    # Pure-JAX reference of the ORIGINAL padded per-token linear semantics.
    ref = jnp.stack(
        [jnp.pad(o, ((0, 0), (0, max_dim - o.shape[1]))) @ weights[i] + biases[i]
         for i, o in enumerate(obs_list)],
        axis=1,
    )
    assert jnp.allclose(out, ref, atol=1e-5), "mismatch vs reference"

    print("KERNEL_OK")
</pallas_src>

<mosaic_0001>
module attributes {stable_mosaic.version = 11 : i64} {
  func.func @_block_diag_linear_kernel(%arg0: i32, %arg1: memref<8x24xf32, #tpu.memory_space<vmem>>, %arg2: memref<24x256xf32, #tpu.memory_space<vmem>>, %arg3: memref<1x256xf32, #tpu.memory_space<vmem>>, %arg4: memref<8x256xf32, #tpu.memory_space<vmem>>) attributes {dimension_semantics = [#tpu.dimension_semantics<parallel>], iteration_bounds = array<i64: 1>, scalar_prefetch = 0 : i64, scratch_operands = 0 : i64, tpu.core_type = #tpu.core_type<tc>, window_params = [{transform_indices = @transform_0, window_bounds = array<i64: 8, 24>}, {pipeline_mode = #tpu.pipeline_mode<synchronous>, transform_indices = @transform_1, window_bounds = array<i64: 24, 256>}, {pipeline_mode = #tpu.pipeline_mode<synchronous>, transform_indices = @transform_2, window_bounds = array<i64: 1, 256>}, {transform_indices = @transform_3, window_bounds = array<i64: 8, 256>}]} {
    %c0 = arith.constant 0 : index
    %c0_0 = arith.constant 0 : index
    %0 = vector.load %arg1[%c0, %c0_0] : memref<8x24xf32, #tpu.memory_space<vmem>>, vector<8x24xf32>
    %c0_1 = arith.constant 0 : index
    %c0_2 = arith.constant 0 : index
    %1 = vector.load %arg2[%c0_1, %c0_2] : memref<24x256xf32, #tpu.memory_space<vmem>>, vector<24x256xf32>
    %cst = arith.constant dense<0.000000e+00> : vector<8x256xf32>
    %2 = tpu.matmul %0, %1, %cst {dimension_numbers = #tpu.dot_dimension_numbers<[1], [0], [0], [1], [0, 0, 1, 1], [], []>} : vector<8x24xf32>, vector<24x256xf32>, vector<8x256xf32> -> vector<8x256xf32>
    %c0_3 = arith.constant 0 : index
    %c0_4 = arith.constant 0 : index
    %3 = vector.load %arg3[%c0_3, %c0_4] : memref<1x256xf32, #tpu.memory_space<vmem>>, vector<1x256xf32>
    %4 = vector.broadcast %3 : vector<1x256xf32> to vector<8x256xf32>
    %5 = arith.addf %2, %4 : vector<8x256xf32>
    %c0_5 = arith.constant 0 : index
    %c0_6 = arith.constant 0 : index
    %6 = vector.load %arg4[%c0_5, %c0_6] : memref<8x256xf32, #tpu.memory_space<vmem>>, vector<8x256xf32>
    tpu.vector_store %arg4[%c0_5, %c0_6], %5 {strides = array<i32>} : memref<8x256xf32, #tpu.memory_space<vmem>>, vector<8x256xf32>,
    return
  }
  func.func @transform_0(%arg0: i32) -> (i32, i32) {
    %c0_i32 = arith.constant 0 : i32
    %c0_i32_0 = arith.constant 0 : i32
    return %arg0, %c0_i32 : i32, i32
  }
  func.func @transform_1(%arg0: i32) -> (i32, i32) {
    %c0_i32 = arith.constant 0 : i32
    %c0_i32_0 = arith.constant 0 : i32
    %c0_i32_1 = arith.constant 0 : i32
    return %c0_i32, %c0_i32_0 : i32, i32
  }
  func.func @transform_2(%arg0: i32) -> (i32, i32) {
    %c0_i32 = arith.constant 0 : i32
    %c0_i32_0 = arith.constant 0 : i32
    %c0_i32_1 = arith.constant 0 : i32
    return %c0_i32, %c0_i32_0 : i32, i32
  }
  func.func @transform_3(%arg0: i32) -> (i32, i32) {
    %c0_i32 = arith.constant 0 : i32
    %c0_i32_0 = arith.constant 0 : i32
    return %arg0, %c0_i32 : i32, i32
  }
}

</mosaic_0001>

<bundles_post_ra>
// kernel: tpu_custom_call.1
= control target key start
LH: loop header
LB: loop body
LE: loop exit
PB: predicated region body
PF: predicated region fallthrough
CT: control target
= control target key end

     0   :  { %8 = vsyncpa [#allocation3], 0  ;;  %s283_s0 = inlined_call_operand.hbm [shape: f32[8,24], index: 0, kind: input, shape index: {}]   ;;  %s284_s1 = inlined_call_operand.hbm [shape: f32[24,256], index: 1, kind: input, shape index: {}]   ;;  %s285_s2 = inlined_call_operand.hbm [shape: f32[1,256], index: 2, kind: input, shape index: {}]   ;;  %s286_s3 = inlined_call_operand.hbm [shape: f32[8,256], index: 3, kind: output, shape index: {}]  }
   0x1   :  { %9 = vsyncpa [#allocation6], 0  ;;  %s26_s14 = sshll.u32 %s284_s1, 4  ;;  %s27_s14 = int_to_ptr.hbm [resolvable:$true] %s26_s14 }
   0x2   :  { %10 = vsyncpa [#allocation4], 0  ;;  %s245_s15 = smov [#allocation5]   ;;  %s16_s19 = sshll.u32 %s283_s0, 4  ;;  %s17_s19 = int_to_ptr.hbm [resolvable:$true] %s16_s19 }
   0x3   :  { %s28_s16 = sshll.u32 %s245_s15, 4  ;;  %s246_s20 = smov 256   ;;  %s29_s16 = int_to_ptr.vmem [resolvable:$true] %s28_s16 }
   0x4   :  { %s247_s21 = smov 16   ;;  %s248_s22 = smov [#allocation2]  }
   0x5   :  { %34 = dma.hbm_to_vmem [thread:$0]  %s27_s14, 768, %s29_s16, [#allocation6], %s246_s20, %s246_s20, %s247_s21  }
   0x6   :  { %s18_s23 = sshll.u32 %s248_s22, 4  ;;  %s40_s26 = sshll.u32 %s285_s2, 4  ;;  %s19_s23 = int_to_ptr.vmem [resolvable:$true] %s18_s23  ;;  %s41_s26 = int_to_ptr.hbm [resolvable:$true] %s40_s26 }
   0x7   :  { %21 = dma.hbm_to_vmem [thread:$0]  %s17_s19, 128, %s19_s23, [#allocation3]  }
   0x8   :  { %s249_s1 = smov [#allocation7]  }
   0x9   :  { %s42_s27 = sshll.u32 %s249_s1, 4  ;;  %s43_s27 = int_to_ptr.vmem [resolvable:$true] %s42_s27 }
   0xa   :  { %45 = dma.hbm_to_vmem [thread:$0]  %s41_s26, 32, %s43_s27, [#allocation6]  }
   0xb   :  { %239 = dma.done.wait [#allocation3], 128  }
   0xc   :  { %240 = vsyncadd [#allocation3], 4294967168 }
   0xd   :  { %241 = dma.done.wait [#allocation6], 800  }
   0xe   :  { %242 = vsyncadd [#allocation6], 4294966496  ;;  %v63_v0 = vld [vmem:[#allocation5 + $0x20] sm:$0xff]  ;;  %v64_v1 = vld [vmem:[#allocation5 + $0x28] sm:$0xff]  ;;  %vm71_vm0 = vcmask 195584   ;;  %s250_s0 = smov [#allocation8]  }
   0xf   :  { %v61_v2 = vld [vmem:[#allocation5 + $0x10] sm:$0xff]  ;;  %88 = vmatpush.msra.mxu0 %v63_v0  ;;  %108 = vmatpush.msra.mxu1 %v64_v1  ;;  %v62_v3 = vld [vmem:[#allocation5 + $0x18] sm:$0xff]  ;;  %v59_v4 = vld [vmem:[#allocation5] sm:$0xff]  ;;  %s122_s2 = sshll.u32 %s250_s0, 4  ;;  %s124_s30 = sshll.u32 %s286_s3, 4  ;;  %s123_s2 = int_to_ptr.vmem [resolvable:$true] %s122_s2  ;;  %s125_s30 = int_to_ptr.hbm [resolvable:$true] %s124_s30 }
  0x10   :  { %v60_v5 = vld [vmem:[#allocation5 + $0x8] sm:$0xff]  ;;  %v58_v6 = vld [vmem:[#allocation2] sm:$0xff]  ;;  %v65_v7 = vld [vmem:[#allocation7] sm:$0x3] }
  0x11   :  { %89 = vmatpush.msra.mxu0 %v61_v2  ;;  %109 = vmatpush.msra.mxu1 %v62_v3  ;;  %v67_v8 = vperm.slane %v65_v7, 0  ;;  %v68_v9 = vperm.slane %v65_v7, 1 }
  0x13   :  { %90 = vmatpush.msra.mxu0 %v59_v4  ;;  %110 = vmatpush.msra.mxu1 %v60_v5 }
  0x14   :  { %135 = vmatmul.msk.f32.vlgmr.msra.gmra.mxu0 %vm71_vm0, %v58_v6  ;;  %136 = vmatmul.msk.f32.vlgmr.msra.gmra.mxu1 %vm71_vm0, %v58_v6 }
  0x91   :  { %v92_v10 = vpop.f32.mrf.mxu0  ;;  %v112_v11 = vpop.f32.mrf.mxu1 }
  0x92   :  { %v93_v12 = vadd.f32 %v92_v10, %v67_v8  ;;  %v113_v13 = vadd.f32 %v112_v11, %v68_v9 }
  0x94   :  { %115 = vst [vmem:[#allocation8] sm:$0xff] %v93_v12 }
  0x95   :  { %116 = vst [vmem:[#allocation8 + $0x8] sm:$0xff] %v113_v13 }
  0x96   :  { %127 = dma.vmem_to_hbm [thread:$0]  %s123_s2, 256, %s125_s30, [#allocation4]  }
  0x97   :  { %243 = dma.done.wait [#allocation4], 256  }
  0x98   :  { %244 = vsyncadd [#allocation4], 4294967040 }
  0x99   :  { %132 = vsyncpa [#allocation3], 1 }
  0x9a   :  { %133 = vsyncpa [#allocation6], 1 }
  0x9b   :  { %134 = vsyncpa [#allocation4], 1 }

</bundles_post_ra>
